<compile_context>
chip_gen: v6e
topology: v6e:2x2x1
jax: 0.10.0
libtpu: 0.0.40
codegen_flags: <defaults>
</compile_context>

<pallas_src>
import jax
import jax.numpy as jnp
from jax.experimental import pallas as pl
from jax.experimental.pallas import tpu as pltpu


def _round_up(x, m):
    return (x + m - 1) // m * m


def _generator_loss_tile_kernel(node_ref, neigh_ref, bias_ref, reward_ref,
                                main_out_ref, l2_out_ref):
    """One (TB, Dp) batch tile -> per-tile partial sums (lane-broadcast)."""
    ne = node_ref[...].astype(jnp.float32)        # (TB, Dp)
    be = neigh_ref[...].astype(jnp.float32)       # (TB, Dp)
    bias = bias_ref[...].astype(jnp.float32)      # (TB, 1)
    rew = reward_ref[...].astype(jnp.float32)     # (TB, 1)

    # score_i = <node_i, neigh_i> + bias_i     (VPU multiply + XLU lane reduce)
    dot = jnp.sum(ne * be, axis=1, keepdims=True)              # (TB, 1)
    score = dot + bias

    # prob = clamp(sigmoid(score), 1e-5, 1);  main term = log(prob) * reward
    prob = jnp.clip(jax.nn.sigmoid(score), 1e-5, 1.0)
    main_terms = jnp.log(prob) * rew                            # (TB, 1)
    main_partial = jnp.sum(main_terms, axis=0, keepdims=True)   # (1, 1)

    # L2 partial: sum(ne^2) + sum(be^2) + sum(bias^2)  (the 0.5 factor and
    # lambda_gen are applied in the wrapper epilogue).
    l2_rows = jnp.sum(ne * ne + be * be, axis=1, keepdims=True)     # (TB, 1)
    l2_partial = jnp.sum(l2_rows + bias * bias, axis=0, keepdims=True)

    # Lane-dense (1, 128) output blocks (unmasked vst); wrapper reads lane 0.
    main_out_ref[...] = jnp.broadcast_to(main_partial, main_out_ref.shape)
    l2_out_ref[...] = jnp.broadcast_to(l2_partial, l2_out_ref.shape)


def generator_loss(node_emd, bias_vector, node_ids, neighbor_ids, reward,
                   lambda_gen, *, tile_rows=512):
    """Forward pass of GraphGAN Generator, returning the scalar loss."""
    n_node, emd_size = node_emd.shape
    batch = int(node_ids.shape[0])

    node_ids = node_ids.astype(jnp.int32)
    neighbor_ids = neighbor_ids.astype(jnp.int32)

    # --- gather the [B, D] operands once in the wrapper (contiguous blocks
    #     feed the kernel; per-row fused DMA gathers are latency-bound) ---
    node_emd_f = node_emd.astype(jnp.float32)
    node_g = jnp.take(node_emd_f, node_ids, axis=0)        # (B, D)
    neigh_g = jnp.take(node_emd_f, neighbor_ids, axis=0)   # (B, D)
    bias_g = jnp.take(bias_vector.astype(jnp.float32), neighbor_ids, axis=0)
    reward_f = reward.astype(jnp.float32)

    # --- batch tiling + lane padding (both mathematically exact) ---
    d_pad = _round_up(emd_size, 128)                 # lane-dense rows
    tb = min(int(tile_rows), _round_up(batch, 8))    # rows per grid step
    b_pad = _round_up(batch, tb)
    row_pad = b_pad - batch
    col_pad = d_pad - emd_size

    node_g = jnp.pad(node_g, ((0, row_pad), (0, col_pad)))
    neigh_g = jnp.pad(neigh_g, ((0, row_pad), (0, col_pad)))
    bias_col = jnp.pad(bias_g, ((0, row_pad),)).reshape(b_pad, 1)
    reward_col = jnp.pad(reward_f, ((0, row_pad),)).reshape(b_pad, 1)

    num_tiles = b_pad // tb

    main_part, l2_part = pl.pallas_call(
        _generator_loss_tile_kernel,
        grid=(num_tiles,),
        in_specs=[
            pl.BlockSpec((tb, d_pad), lambda i: (i, 0)),   # node rows
            pl.BlockSpec((tb, d_pad), lambda i: (i, 0)),   # neighbor rows
            pl.BlockSpec((tb, 1), lambda i: (i, 0)),       # bias column
            pl.BlockSpec((tb, 1), lambda i: (i, 0)),       # reward column
        ],
        out_specs=(
            pl.BlockSpec((1, 128), lambda i: (i, 0)),      # main partials
            pl.BlockSpec((1, 128), lambda i: (i, 0)),      # L2 partials
        ),
        out_shape=(
            jax.ShapeDtypeStruct((num_tiles, 128), jnp.float32),
            jax.ShapeDtypeStruct((num_tiles, 128), jnp.float32),
        ),
        compiler_params=pltpu.CompilerParams(
            dimension_semantics=("parallel",)),            # independent tiles
        cost_estimate=pl.CostEstimate(
            flops=6 * b_pad * d_pad,
            transcendentals=2 * b_pad,
            bytes_accessed=2 * b_pad * d_pad * 4 + 8 * b_pad
                           + 2 * num_tiles * 128 * 4),
    )(node_g, neigh_g, bias_col, reward_col)

    # Tiny epilogue: combine per-tile partials, mean over the TRUE batch size,
    # apply the 0.5 l2_loss factor and lambda_gen.
    main_sum = jnp.sum(main_part[:, 0])
    l2_sum = jnp.sum(l2_part[:, 0])
    return -(main_sum / batch) + lambda_gen * 0.5 * l2_sum


def _reference_loss(node_emd, bias_vector, node_ids, neighbor_ids, reward,
                    lambda_gen):
    node_emb = node_emd[node_ids].astype(jnp.float32)
    neigh_emb = node_emd[neighbor_ids].astype(jnp.float32)
    bias = bias_vector[neighbor_ids].astype(jnp.float32)
    score = jnp.sum(node_emb * neigh_emb, axis=1) + bias
    prob = jnp.clip(jax.nn.sigmoid(score), 1e-5, 1.0)
    main = -jnp.mean(jnp.log(prob) * reward.astype(jnp.float32))
    l2 = 0.5 * (jnp.sum(node_emb ** 2) + jnp.sum(neigh_emb ** 2)
                + jnp.sum(bias ** 2))
    return main + lambda_gen * l2


if __name__ == "__main__":
    key = jax.random.PRNGKey(0)
    k_emb, k_ids, k_nbr, k_rwd, k_bias = jax.random.split(key, 5)

    # Small shapes consistent with GraphGAN (default n_emb=50); batch=37 and
    # emd_size=50 deliberately exercise the row/lane zero-padding paths.
    n_node, emd_size, batch = 64, 50, 37
    lambda_gen = 1e-5

    # Deterministic "pretrained" embedding init (as in __init__); bias made
    # nonzero so the bias path is exercised.
    node_emd_init = jax.random.normal(k_emb, (n_node, emd_size),
                                      dtype=jnp.float32) * 0.1
    bias_vector = jax.random.normal(k_bias, (n_node,), dtype=jnp.float32) * 0.01

    node_ids = jax.random.randint(k_ids, (batch,), 0, n_node)
    neighbor_ids = jax.random.randint(k_nbr, (batch,), 0, n_node)
    reward = jax.random.uniform(k_rwd, (batch,), dtype=jnp.float32)

    loss = generator_loss(node_emd_init, bias_vector, node_ids, neighbor_ids,
                          reward, lambda_gen)
    loss = jax.block_until_ready(loss)

    ref = _reference_loss(node_emd_init, bias_vector, node_ids, neighbor_ids,
                          reward, lambda_gen)
    assert jnp.allclose(loss, ref, rtol=1e-5, atol=1e-6), (loss, ref)

    print("KERNEL_OK")
</pallas_src>

<mosaic_0001>
module attributes {stable_mosaic.version = 11 : i64} {
  func.func @_generator_loss_tile_kernel(%arg0: i32, %arg1: memref<40x128xf32, #tpu.memory_space<vmem>>, %arg2: memref<40x128xf32, #tpu.memory_space<vmem>>, %arg3: memref<40x1xf32, #tpu.memory_space<vmem>>, %arg4: memref<40x1xf32, #tpu.memory_space<vmem>>, %arg5: memref<1x128xf32, #tpu.memory_space<vmem>>, %arg6: memref<1x128xf32, #tpu.memory_space<vmem>>) attributes {dimension_semantics = [#tpu.dimension_semantics<parallel>], iteration_bounds = array<i64: 1>, scalar_prefetch = 0 : i64, scratch_operands = 0 : i64, tpu.core_type = #tpu.core_type<tc>, window_params = [{transform_indices = @transform_0, window_bounds = array<i64: 40, 128>}, {transform_indices = @transform_1, window_bounds = array<i64: 40, 128>}, {transform_indices = @transform_2, window_bounds = array<i64: 40, 1>}, {transform_indices = @transform_3, window_bounds = array<i64: 40, 1>}, {transform_indices = @transform_4, window_bounds = array<i64: 1, 128>}, {transform_indices = @transform_5, window_bounds = array<i64: 1, 128>}]} {
    %c0 = arith.constant 0 : index
    %c0_0 = arith.constant 0 : index
    %0 = vector.load %arg1[%c0, %c0_0] : memref<40x128xf32, #tpu.memory_space<vmem>>, vector<40x128xf32>
    %c0_1 = arith.constant 0 : index
    %c0_2 = arith.constant 0 : index
    %1 = vector.load %arg2[%c0_1, %c0_2] : memref<40x128xf32, #tpu.memory_space<vmem>>, vector<40x128xf32>
    %c0_3 = arith.constant 0 : index
    %c0_4 = arith.constant 0 : index
    %2 = vector.load %arg3[%c0_3, %c0_4] : memref<40x1xf32, #tpu.memory_space<vmem>>, vector<40x1xf32>
    %c0_5 = arith.constant 0 : index
    %c0_6 = arith.constant 0 : index
    %3 = vector.load %arg4[%c0_5, %c0_6] : memref<40x1xf32, #tpu.memory_space<vmem>>, vector<40x1xf32>
    %4 = arith.mulf %0, %1 : vector<40x128xf32>
    %cst = arith.constant dense<0.000000e+00> : vector<40xf32>
    %5 = vector.multi_reduction <add>, %4, %cst [1] : vector<40x128xf32> to vector<40xf32>
    %6 = vector.shape_cast %5 : vector<40xf32> to vector<40x1xf32>
    %7 = arith.addf %6, %2 : vector<40x1xf32>
    %8 = arith.negf %7 : vector<40x1xf32>
    %9 = math.exp %8 : vector<40x1xf32>
    %cst_7 = arith.constant 1.000000e+00 : f32
    %10 = vector.broadcast %cst_7 : f32 to vector<40x1xf32>
    %11 = arith.addf %10, %9 : vector<40x1xf32>
    %12 = arith.divf %10, %11 : vector<40x1xf32>
    %cst_8 = arith.constant 9.99999974E-6 : f32
    %cst_9 = arith.constant 1.000000e+00 : f32
    %13 = vector.broadcast %cst_8 : f32 to vector<40x1xf32>
    %14 = arith.maximumf %13, %12 : vector<40x1xf32>
    %15 = vector.broadcast %cst_9 : f32 to vector<40x1xf32>
    %16 = arith.minimumf %15, %14 : vector<40x1xf32>
    %17 = math.log %16 : vector<40x1xf32>
    %18 = arith.mulf %17, %3 : vector<40x1xf32>
    %cst_10 = arith.constant dense<0.000000e+00> : vector<1xf32>
    %19 = vector.multi_reduction <add>, %18, %cst_10 [0] : vector<40x1xf32> to vector<1xf32>
    %20 = vector.shape_cast %19 : vector<1xf32> to vector<1x1xf32>
    %21 = arith.mulf %0, %0 : vector<40x128xf32>
    %22 = arith.mulf %1, %1 : vector<40x128xf32>
    %23 = arith.addf %21, %22 : vector<40x128xf32>
    %cst_11 = arith.constant dense<0.000000e+00> : vector<40xf32>
    %24 = vector.multi_reduction <add>, %23, %cst_11 [1] : vector<40x128xf32> to vector<40xf32>
    %25 = vector.shape_cast %24 : vector<40xf32> to vector<40x1xf32>
    %26 = arith.mulf %2, %2 : vector<40x1xf32>
    %27 = arith.addf %25, %26 : vector<40x1xf32>
    %cst_12 = arith.constant dense<0.000000e+00> : vector<1xf32>
    %28 = vector.multi_reduction <add>, %27, %cst_12 [0] : vector<40x1xf32> to vector<1xf32>
    %29 = vector.shape_cast %28 : vector<1xf32> to vector<1x1xf32>
    %30 = vector.shape_cast %20 : vector<1x1xf32> to vector<1x1xf32>
    %31 = vector.broadcast %30 : vector<1x1xf32> to vector<1x128xf32>
    %c0_13 = arith.constant 0 : index
    %c0_14 = arith.constant 0 : index
    %32 = vector.load %arg5[%c0_13, %c0_14] : memref<1x128xf32, #tpu.memory_space<vmem>>, vector<1x128xf32>
    tpu.vector_store %arg5[%c0_13, %c0_14], %31 {strides = array<i32>} : memref<1x128xf32, #tpu.memory_space<vmem>>, vector<1x128xf32>,
    %33 = vector.shape_cast %29 : vector<1x1xf32> to vector<1x1xf32>
    %34 = vector.broadcast %33 : vector<1x1xf32> to vector<1x128xf32>
    %c0_15 = arith.constant 0 : index
    %c0_16 = arith.constant 0 : index
    %35 = vector.load %arg6[%c0_15, %c0_16] : memref<1x128xf32, #tpu.memory_space<vmem>>, vector<1x128xf32>
    tpu.vector_store %arg6[%c0_15, %c0_16], %34 {strides = array<i32>} : memref<1x128xf32, #tpu.memory_space<vmem>>, vector<1x128xf32>,
    return
  }
  func.func @transform_0(%arg0: i32) -> (i32, i32) {
    %c0_i32 = arith.constant 0 : i32
    %c0_i32_0 = arith.constant 0 : i32
    return %arg0, %c0_i32 : i32, i32
  }
  func.func @transform_1(%arg0: i32) -> (i32, i32) {
    %c0_i32 = arith.constant 0 : i32
    %c0_i32_0 = arith.constant 0 : i32
    return %arg0, %c0_i32 : i32, i32
  }
  func.func @transform_2(%arg0: i32) -> (i32, i32) {
    %c0_i32 = arith.constant 0 : i32
    %c0_i32_0 = arith.constant 0 : i32
    return %arg0, %c0_i32 : i32, i32
  }
  func.func @transform_3(%arg0: i32) -> (i32, i32) {
    %c0_i32 = arith.constant 0 : i32
    %c0_i32_0 = arith.constant 0 : i32
    return %arg0, %c0_i32 : i32, i32
  }
  func.func @transform_4(%arg0: i32) -> (i32, i32) {
    %c0_i32 = arith.constant 0 : i32
    %c0_i32_0 = arith.constant 0 : i32
    return %arg0, %c0_i32 : i32, i32
  }
  func.func @transform_5(%arg0: i32) -> (i32, i32) {
    %c0_i32 = arith.constant 0 : i32
    %c0_i32_0 = arith.constant 0 : i32
    return %arg0, %c0_i32 : i32, i32
  }
}

</mosaic_0001>

<bundles_post_ra>
// kernel: tpu_custom_call.1
= control target key start
LH: loop header
LB: loop body
LE: loop exit
PB: predicated region body
PF: predicated region fallthrough
CT: control target
= control target key end

     0   :  { %11 = vsyncpa [#allocation3], 0  ;;  %s415_s0 = inlined_call_operand.vmem [shape: f32[40,128], index: 0, kind: input, shape index: {}]   ;;  %s416_s1 = inlined_call_operand.vmem [shape: f32[40,128], index: 1, kind: input, shape index: {}]   ;;  %s417_s2 = inlined_call_operand.vmem [shape: f32[40,1], index: 2, kind: input, shape index: {}]   ;;  %s418_s3 = inlined_call_operand.vmem [shape: f32[40,1], index: 3, kind: input, shape index: {}]   ;;  %s419_s4 = inlined_call_operand.hbm [shape: f32[1,128], index: 4, kind: output, shape index: {0}]   ;;  %s420_s5 = inlined_call_operand.hbm [shape: f32[1,128], index: 5, kind: output, shape index: {1}]  }
   0x1   :  { %v21_v0 = vld [vmem:[%s415_s0] sm:$0xff]  ;;  %v23_v2 = vld [vmem:[%s415_s0 + $0x10] sm:$0xff]  ;;  %v22_v5 = vld [vmem:[%s415_s0 + $0x8] sm:$0xff] }
   0x2   :  { %v26_v1 = vld [vmem:[%s416_s1] sm:$0xff]  ;;  %v28_v4 = vld [vmem:[%s416_s1 + $0x10] sm:$0xff]  ;;  %v27_v6 = vld [vmem:[%s416_s1 + $0x8] sm:$0xff]  ;;  %v132_v11 = vmul.f32 %v21_v0, %v21_v0 }
   0x3   :  { %v41_v3 = vmul.f32 %v26_v1, %v21_v0  ;;  %v43_v7 = vmul.f32 %v28_v4, %v23_v2  ;;  %v24_v8 = vld [vmem:[%s415_s0 + $0x18] sm:$0xff]  ;;  %v42_v10 = vmul.f32 %v27_v6, %v22_v5  ;;  %v137_v12 = vmul.f32 %v26_v1, %v26_v1  ;;  %v25_v14 = vld [vmem:[%s415_s0 + $0x20] sm:$0xff] }
   0x4   :  { %v29_v9 = vld [vmem:[%s416_s1 + $0x18] sm:$0xff]  ;;  %v30_v15 = vld [vmem:[%s416_s1 + $0x20] sm:$0xff] }
   0x5   :  { %46 = vadd.xlane.f32.xlu0 %v41_v3  ;;  %50 = vadd.xlane.f32.xlu1 %v43_v7  ;;  %v44_v13 = vmul.f32 %v29_v9, %v24_v8 }
   0x6   :  { %12 = vsyncpa [#allocation5], 0  ;;  %v45_v16 = vmul.f32 %v30_v15, %v25_v14  ;;  %v133_v17 = vmul.f32 %v22_v5, %v22_v5  ;;  %v138_v18 = vmul.f32 %v27_v6, %v27_v6  ;;  %v134_v19 = vmul.f32 %v23_v2, %v23_v2  ;;  %v31_v31 = vld [vmem:[%s417_s2] sm:$0xff]  ;;  %v33_v32 = vld [vmem:[%s417_s2 + $0x10] sm:$0xff] }
   0x7   :  { %v139_v20 = vmul.f32 %v28_v4, %v28_v4  ;;  %v142_v21 = vadd.f32 %v137_v12, %v132_v11  ;;  %v135_v23 = vmul.f32 %v24_v8, %v24_v8  ;;  %v140_v24 = vmul.f32 %v29_v9, %v29_v9  ;;  %v32_v37 = vld [vmem:[%s417_s2 + $0x8] sm:$0xff]  ;;  %v34_v39 = vld [vmem:[%s417_s2 + $0x18] sm:$0xff]  ;;  %v35_v45 = vld [vmem:[%s417_s2 + $0x20] sm:$0xff] }
   0x8   :  { %v143_v22 = vadd.f32 %v138_v18, %v133_v17  ;;  %v136_v26 = vmul.f32 %v25_v14, %v25_v14  ;;  %v141_v27 = vmul.f32 %v30_v15, %v30_v15  ;;  %v306_v30 = vmov 0  }
   0x9   :  { %48 = vadd.xlane.f32.xlu0 %v42_v10  ;;  %52 = vadd.xlane.f32.xlu1 %v44_v13  ;;  %v144_v25 = vadd.f32 %v139_v20, %v134_v19  ;;  %v145_v28 = vadd.f32 %v140_v24, %v135_v23  ;;  %v157_v46 = vmul.f32 %v31_v31, %v31_v31  ;;  %vm116_vm0 = vcmask 7168  }
   0xa   :  { %v146_v29 = vadd.f32 %v141_v27, %v136_v26  ;;  %231 = vset.pattern.permute.xlu1 %v306_v30  ;;  %230 = vset.pattern.permute.xlu0 %v306_v30  ;;  %v158_v52 = vmul.f32 %v32_v37, %v32_v37  ;;  %v159_v54 = vmul.f32 %v33_v32, %v33_v32 }
   0xb   :  { %v160_v60 = vmul.f32 %v34_v39, %v34_v39  ;;  %v161_v62 = vmul.f32 %v35_v45, %v35_v45 }
   0xd   :  { %54 = vadd.xlane.f32.xlu0 %v45_v16  ;;  %147 = vadd.xlane.f32.xlu1 %v142_v21 }
  0x11   :  { %149 = vadd.xlane.f32.xlu0 %v143_v22  ;;  %151 = vadd.xlane.f32.xlu1 %v144_v25 }
  0x15   :  { %153 = vadd.xlane.f32.xlu0 %v145_v28  ;;  %155 = vadd.xlane.f32.xlu1 %v146_v29 }
  0x8e   :  { %v47_v33 = vpop.xlane.xlu0 %46  ;;  %v51_v35 = vpop.xlane.xlu1 %50 }
  0x8f   :  { %v56_v34 = vadd.f32 %v47_v33, %v31_v31  ;;  %v58_v36 = vadd.f32 %v51_v35, %v33_v32 }
  0x91   :  { %v222_v38 = vmul.f32 -1.442695, %v56_v34  ;;  %v224_v40 = vmul.f32 -1.442695, %v58_v36 }
  0x92   :  { %v49_v41 = vpop.xlane.xlu0 %48  ;;  %v53_v43 = vpop.xlane.xlu1 %52 }
  0x93   :  { %232 = vpow2.f32 %v222_v38  ;;  %v57_v42 = vadd.f32 %v49_v41, %v32_v37  ;;  %v59_v44 = vadd.f32 %v53_v43, %v34_v39 }
  0x94   :  { %234 = vpow2.f32 %v224_v40 }
  0x95   :  { %v223_v47 = vmul.f32 -1.442695, %v57_v42  ;;  %v225_v48 = vmul.f32 -1.442695, %v59_v44 }
  0x96   :  { %v55_v49 = vpop.xlane.xlu0 %54  ;;  %v148_v51 = vpop.xlane.xlu1 %147 }
  0x97   :  { %236 = vpow2.f32 %v223_v47  ;;  %v60_v50 = vadd.f32 %v55_v49, %v35_v45  ;;  %v162_v53 = vadd.f32 %v157_v46, %v148_v51  ;;  %v36_v45 = vld [vmem:[%s418_s3] sm:$0xff]  ;;  %v37_v49 = vld [vmem:[%s418_s3 + $0x8] sm:$0xff] }
  0x98   :  { %238 = vpow2.f32 %v225_v48  ;;  %v38_v48 = vld [vmem:[%s418_s3 + $0x10] sm:$0xff] }
  0x99   :  { %v226_v55 = vmul.f32 -1.442695, %v60_v50  ;;  %v167_v57 = vsel %vm116_vm0, %v162_v53, 0.0  ;;  %v39_v53 = vld [vmem:[%s418_s3 + $0x18] sm:$0xff] }
  0x9a   :  { %v150_v56 = vpop.xlane.xlu0 %149  ;;  %v152_v59 = vpop.xlane.xlu1 %151 }
  0x9b   :  { %240 = vpow2.f32 %v226_v55  ;;  %v163_v58 = vadd.f32 %v158_v52, %v150_v56  ;;  %v164_v61 = vadd.f32 %v159_v54, %v152_v59 }
  0x9d   :  { %v168_v63 = vsel %vm116_vm0, %v163_v58, 0.0  ;;  %v170_v1 = vsel %vm116_vm0, %v164_v61, 0.0  ;;  %v40_v58 = vld [vmem:[%s418_s3 + $0x20] sm:$0xff]  ;;  %s307_s3 = smov [#allocation4]  }
  0x9e   :  { %v169_v0 = vadd.f32 %v168_v63, %v167_v57  ;;  %v154_v2 = vpop.xlane.xlu0 %153  ;;  %v156_v4 = vpop.xlane.xlu1 %155  ;;  %s210_s30 = sshll.u32 %s307_s3, 4  ;;  %s211_s30 = int_to_ptr.vmem [resolvable:$true] %s210_s30 }
  0x9f   :  { %v165_v3 = vadd.f32 %v160_v60, %v154_v2  ;;  %v166_v7 = vadd.f32 %v161_v62, %v156_v4  ;;  %s262_s6 = scalar_lea.vmem %s211_s30, 16  ;;  %s266_s7 = scalar_lea.vmem %s211_s30, 32 }
  0xa0   :  { %v233_v5 = vpop.eup %232  ;;  %v171_v6 = vadd.f32 %v170_v1, %v169_v0  ;;  %p263_p0 = scmp.ne.s32.totalorder %s211_s30, %s262_s6  ;;  %p267_p1 = scmp.lt.s32.totalorder %s211_s30, %s211_s30 }
  0xa1   :  { %v235_v8 = vpop.eup %234  ;;  %v76_v9 = vadd.f32 1.0, %v233_v5  ;;  %v172_v10 = vsel %vm116_vm0, %v165_v3, 0.0  ;;  %v174_v13 = vsel %vm116_vm0, %v166_v7, 0.0  ;;  %p268_p2 = scmp.lt.s32.totalorder %s266_s7, %s262_s6 }
  0xa2   :  { %v78_v11 = vadd.f32 1.0, %v235_v8  ;;  %v173_v12 = vadd.f32 %v172_v10, %v171_v6 }
  0xa3   :  { %242 = vrcp.f32 %v76_v9  ;;  %p269_p3 = por %p268_p2, %p267_p1 }
  0xa4   :  { %v237_v14 = vpop.eup %236  ;;  %244 = vrcp.f32 %v78_v11  ;;  %v175_v15 = vadd.f32 %v174_v13, %v173_v12 }
  0xa5   :  { %v239_v16 = vpop.eup %238  ;;  %v77_v17 = vadd.f32 1.0, %v237_v14  ;;  %p270_p4 = pnand %p269_p3, %p263_p0 }
  0xa6   :  { %v79_v18 = vadd.f32 1.0, %v239_v16  ;;  %v176_v19 = vrot.slane %v175_v15, 4 }
  0xa7   :  { %246 = vrcp.f32 %v77_v17 }
  0xa8   :  { %v241_v20 = vpop.eup %240  ;;  %248 = vrcp.f32 %v79_v18  ;;  %v177_v21 = vadd.f32 %v176_v19, %v175_v15 }
  0xa9   :  { %v80_v22 = vadd.f32 1.0, %v241_v20 }
  0xaa   :  { %v178_v23 = vrot.slane %v177_v21, 2 }
  0xab   :  { %250 = vrcp.f32 %v80_v22 }
  0xac   :  { %v179_v24 = vadd.f32 %v178_v23, %v177_v21 }
  0xae   :  { %v180_v25 = vrot.slane %v179_v24, 1 }
  0xb0   :  { %v243_v26 = vpop.eup %242  ;;  %v181_v27 = vadd.f32 %v180_v25, %v179_v24 }
  0xb1   :  { %v245_v28 = vpop.eup %244  ;;  %v91_v29 = vmax.f32 %v243_v26, 1e-05 }
  0xb2   :  { %v93_v30 = vmax.f32 %v245_v28, 1e-05  ;;  %190 = vperm.xlu1 %231, %v181_v27  }
  0xb3   :  { %v96_v31 = vmin.f32 %v91_v29, 1.0 }
  0xb4   :  { %v247_v32 = vpop.eup %246  ;;  %v98_v33 = vmin.f32 %v93_v30, 1.0 }
  0xb5   :  { %v249_v34 = vpop.eup %248  ;;  %252 = vlog2.f32 %v96_v31  ;;  %v92_v35 = vmax.f32 %v247_v32, 1e-05 }
  0xb6   :  { %254 = vlog2.f32 %v98_v33  ;;  %v94_v36 = vmax.f32 %v249_v34, 1e-05 }
  0xb7   :  { %v97_v37 = vmin.f32 %v92_v35, 1.0 }
  0xb8   :  { %v251_v38 = vpop.eup %250  ;;  %v99_v39 = vmin.f32 %v94_v36, 1.0 }
  0xb9   :  { %256 = vlog2.f32 %v97_v37  ;;  %v95_v40 = vmax.f32 %v251_v38, 1e-05 }
  0xba   :  { %258 = vlog2.f32 %v99_v39 }
  0xbb   :  { %v100_v41 = vmin.f32 %v95_v40, 1.0 }
  0xbd   :  { %260 = vlog2.f32 %v100_v41 }
  0xc2   :  { %v253_v42 = vpop.eup %252 }
  0xc3   :  { %v255_v43 = vpop.eup %254  ;;  %v102_v44 = vmul.f32 0.6931472, %v253_v42 }
  0xc4   :  { %v106_v46 = vmul.f32 0.6931472, %v255_v43 }
  0xc5   :  { %v111_v51 = vmul.f32 %v102_v44, %v36_v45 }
  0xc6   :  { %v257_v47 = vpop.eup %256  ;;  %v113_v55 = vmul.f32 %v106_v46, %v38_v48 }
  0xc7   :  { %v259_v50 = vpop.eup %258  ;;  %v104_v52 = vmul.f32 0.6931472, %v257_v47  ;;  %v117_v61 = vsel %vm116_vm0, %v111_v51, 0.0 }
  0xc8   :  { %v108_v54 = vmul.f32 0.6931472, %v259_v50  ;;  %v120_v1 = vsel %vm116_vm0, %v113_v55, 0.0 }
  0xc9   :  { %v112_v56 = vmul.f32 %v104_v52, %v37_v49 }
  0xca   :  { %v261_v57 = vpop.eup %260  ;;  %v114_v59 = vmul.f32 %v108_v54, %v39_v53 }
  0xcb   :  { %v110_v60 = vmul.f32 0.6931472, %v261_v57  ;;  %v118_v62 = vsel %vm116_vm0, %v112_v56, 0.0 }
  0xcc   :  { %v119_v63 = vadd.f32 %v118_v62, %v117_v61  ;;  %v122_v2 = vsel %vm116_vm0, %v114_v59, 0.0 }
  0xcd   :  { %v115_v0 = vmul.f32 %v110_v60, %v40_v58 }
  0xce   :  { %v121_v3 = vadd.f32 %v120_v1, %v119_v63 }
  0xcf   :  { %v124_v4 = vsel %vm116_vm0, %v115_v0, 0.0 }
  0xd0   :  { %v123_v5 = vadd.f32 %v122_v2, %v121_v3 }
  0xd2   :  { %v125_v6 = vadd.f32 %v124_v4, %v123_v5 }
  0xd4   :  { %v126_v7 = vrot.slane %v125_v6, 4 }
  0xd6   :  { %v127_v8 = vadd.f32 %v126_v7, %v125_v6 }
  0xd8   :  { %v128_v9 = vrot.slane %v127_v8, 2 }
  0xda   :  { %v129_v10 = vadd.f32 %v128_v9, %v127_v8 }
  0xdc   :  { %v130_v11 = vrot.slane %v129_v10, 1 }
  0xde   :  { %v131_v12 = vadd.f32 %v130_v11, %v129_v10 }
  0xe0   :  { %184 = vperm.xlu0 %230, %v131_v12  }
 0x12d   :  { %v191_v13 = vpop.permute.xlu1 %190 }
 0x12e   :  { %193 = vst [vmem:[#allocation4] sm:$0x1] %v191_v13 }
 0x12f   :  { %273 = shalt.err (!%p270_p4)
}
 0x130   :  { %213 = dma.vmem_to_hbm [thread:$0]  %s211_s30, 16, %s420_s5, [#allocation5]  }
 0x131   :  { %s308_s10 = smov [#allocation2]  }
 0x132   :  { %s200_s11 = sshll.u32 %s308_s10, 4  ;;  %s201_s11 = int_to_ptr.vmem [resolvable:$true] %s200_s11 }
 0x133   :  { %s282_s12 = scalar_lea.vmem %s201_s11, 16  ;;  %s286_s0 = scalar_lea.vmem %s201_s11, 32 }
 0x134   :  { %p283_p5 = scmp.ne.s32.totalorder %s201_s11, %s282_s12  ;;  %p287_p6 = scmp.lt.s32.totalorder %s201_s11, %s201_s11 }
 0x135   :  { %p288_p7 = scmp.lt.s32.totalorder %s286_s0, %s282_s12 }
 0x137   :  { %p289_p8 = por %p288_p7, %p287_p6 }
 0x139   :  { %p290_p9 = pnand %p289_p8, %p283_p5 }
 0x15b   :  { %v185_v14 = vpop.permute.xlu0 %184 }
 0x15c   :  { %187 = vst [vmem:[#allocation2] sm:$0x1] %v185_v14 }
 0x15d   :  { %293 = shalt.err (!%p290_p9)
}
 0x15e   :  { %203 = dma.vmem_to_hbm [thread:$0]  %s201_s11, 16, %s419_s4, [#allocation3]  }
 0x15f   :  { %302 = dma.done.wait [#allocation3], 16  }
 0x160   :  { %303 = vsyncadd [#allocation3], 4294967280 }
 0x161   :  { %304 = dma.done.wait [#allocation5], 16  }
 0x162   :  { %305 = vsyncadd [#allocation5], 4294967280 }
 0x163   :  { %220 = vsyncpa [#allocation3], 1 }
 0x164   :  { %221 = vsyncpa [#allocation5], 1 }

</bundles_post_ra>
